<compile_context>
chip_gen: v5e
topology: v5e:2x2
jax: 0.10.0
libtpu: 0.0.40
codegen_flags: <defaults>
</compile_context>

<pallas_src>
import jax
import jax.numpy as jnp
import numpy as np
from jax.experimental import pallas as pl
from jax.experimental.pallas import tpu as pltpu


_VMEM_LIMIT = 32 * 1024 * 1024  # conservative: fits v5e/v6e defaults and v7x physical


# ---------------------------------------------------------------------------
# Kernels
# ---------------------------------------------------------------------------

def _std_kernel(x_ref, w_ref, b_ref, o_ref):
    """Fused 1x1 conv (BN scale folded into w) + bias + ReLU.  x: (Cin, ts)."""
    y = jnp.dot(w_ref[...], x_ref[...], preferred_element_type=jnp.float32)
    o_ref[...] = jnp.maximum(y + b_ref[...], 0.0).astype(o_ref.dtype)


def _fused_ds_kernel_factory(k: int, H: int, W: int, has_res: bool):
    """One fused kernel for the whole DSConv/MBConv branch.

    x_ref: (Cin, H*W)  -- spatial in lanes
    w1:    (Chid, Cin) -- BN scale folded in      b1: (Chid, 1)
    wd:    (Chid, k*k) -- BN scale folded in      b2: (Chid, 1)
    w2:    (Cout, Chid)-- BN scale folded in      b3: (Cout, 1)
    """
    HW = H * W
    r = k // 2

    def kernel(x_ref, w1_ref, b1_ref, wd_ref, b2_ref, w2_ref, b3_ref, o_ref):
        x = x_ref[...]                                              # (Cin, HW)

        # --- 1x1 expand + bias + ReLU (hidden stays resident) ---
        h = jnp.dot(w1_ref[...], x, preferred_element_type=jnp.float32)
        h = jnp.maximum(h + b1_ref[...], 0.0)                       # (Chid, HW)

        # --- depthwise kxk, 'same' padding, via lane rolls + boundary masks ---
        wd = wd_ref[...]                                            # (Chid, k*k)
        if k == 1:
            h = h * wd[:, 0:1]
        else:
            col = jax.lax.broadcasted_iota(jnp.int32, (1, HW), 1) % W
            row = jax.lax.broadcasted_iota(jnp.int32, (1, HW), 1) // W
            acc = jnp.zeros_like(h)
            for dy in range(-r, r + 1):
                vy = (row + dy >= 0) & (row + dy < H)
                for dx in range(-r, r + 1):
                    s = dy * W + dx
                    shifted = h if s == 0 else pltpu.roll(h, shift=(-s) % HW, axis=1)
                    mask = vy & (col + dx >= 0) & (col + dx < W)
                    t = (dy + r) * k + (dx + r)
                    tap = wd[:, t:t + 1]                            # (Chid, 1)
                    acc = acc + jnp.where(mask, shifted, 0.0) * tap
            h = acc
        h = jnp.maximum(h + b2_ref[...], 0.0)

        # --- 1x1 project + bias (+ residual from the resident input tile) ---
        y = jnp.dot(w2_ref[...], h, preferred_element_type=jnp.float32) + b3_ref[...]
        if has_res:
            y = y + x
        o_ref[...] = y.astype(o_ref.dtype)

    return kernel


# ---------------------------------------------------------------------------
# Wrappers (pallas_call with BlockSpecs)
# ---------------------------------------------------------------------------

def _pick_spatial_tile(HW: int, cap: int = 2048) -> int:
    """Largest multiple of 128 dividing HW, capped; falls back to full extent."""
    if HW % 128 != 0:
        return HW
    best, d = 128, 128
    while d <= min(cap, HW):
        if HW % d == 0:
            best = d
        d += 128
    return best


def std_branch(x3, kp):
    """x3: (N, Cin, HW).  StdConv(kernel=1) -> BN -> ReLU, fully fused."""
    N, C, HW = x3.shape
    Cout = kp["w"].shape[0]
    ts = _pick_spatial_tile(HW)
    grid = (N, HW // ts)
    return pl.pallas_call(
        _std_kernel,
        out_shape=jax.ShapeDtypeStruct((N, Cout, HW), x3.dtype),
        grid=grid,
        in_specs=[
            pl.BlockSpec((None, C, ts), lambda n, j: (n, 0, j)),
            pl.BlockSpec((Cout, C), lambda n, j: (0, 0)),
            pl.BlockSpec((Cout, 1), lambda n, j: (0, 0)),
        ],
        out_specs=pl.BlockSpec((None, Cout, ts), lambda n, j: (n, 0, j)),
        compiler_params=pltpu.CompilerParams(
            dimension_semantics=("parallel", "parallel"),
            vmem_limit_bytes=_VMEM_LIMIT),
    )(x3, kp["w"], kp["b"])


def fused_ds_branch(x3, kp, H, W, has_res):
    """x3: (N, Cin, HW).  Whole DSConv/MBConv branch in a single pallas_call."""
    N, C, HW = x3.shape
    Chid = kp["w1"].shape[0]
    k = kp["k"]
    kernel = _fused_ds_kernel_factory(k, H, W, has_res)
    return pl.pallas_call(
        kernel,
        out_shape=jax.ShapeDtypeStruct((N, C, HW), x3.dtype),
        grid=(N,),
        in_specs=[
            pl.BlockSpec((None, C, HW), lambda n: (n, 0, 0)),
            pl.BlockSpec((Chid, C), lambda n: (0, 0)),
            pl.BlockSpec((Chid, 1), lambda n: (0, 0)),
            pl.BlockSpec((Chid, k * k), lambda n: (0, 0)),
            pl.BlockSpec((Chid, 1), lambda n: (0, 0)),
            pl.BlockSpec((C, Chid), lambda n: (0, 0)),
            pl.BlockSpec((C, 1), lambda n: (0, 0)),
        ],
        out_specs=pl.BlockSpec((None, C, HW), lambda n: (n, 0, 0)),
        compiler_params=pltpu.CompilerParams(
            dimension_semantics=("parallel",),
            vmem_limit_bytes=_VMEM_LIMIT),
    )(x3, kp["w1"], kp["b1"], kp["wd"], kp["b2"], kp["w2"], kp["b3"])


# ---------------------------------------------------------------------------
# Parameters (raw, deterministic synthetic) + one-time BN folding
# ---------------------------------------------------------------------------

def _fold_bn(key, c, eps=1e-5):
    kg, kb, km, kv = jax.random.split(key, 4)
    gamma = 1.0 + 0.1 * jax.random.normal(kg, (c,), jnp.float32)
    beta = 0.1 * jax.random.normal(kb, (c,), jnp.float32)
    mean = 0.1 * jax.random.normal(km, (c,), jnp.float32)
    var = jnp.abs(jax.random.normal(kv, (c,), jnp.float32)) + 0.5
    scale = gamma / jnp.sqrt(var + eps)
    bias = beta - mean * scale
    return scale, bias


_BRANCH_SPECS = [
    ("std", 1, None),   # 0: StdConv(kernel=1)
    ("ds", 3, 0.5),     # 1: DSConv(kernel=3, expansion=0.5)
    ("ds", 3, 1.0),     # 2: DSConv(kernel=3, expansion=1)
    ("ds", 3, 2.0),     # 3: DSConv(kernel=3, expansion=2)
    ("mb", 1, 2.0),     # 4: MBConv(kernel=1, expansion=2)
    ("mb", 3, 0.5),     # 5: MBConv(kernel=3, expansion=0.5)
    ("mb", 3, 1.0),     # 6: MBConv(kernel=3, expansion=1)
    ("mb", 3, 2.0),     # 7: MBConv(kernel=3, expansion=2)
    ("id", None, None), # 8: Identity
]


def init_block_params(key, channels):
    params = []
    keys = jax.random.split(key, len(_BRANCH_SPECS))
    for bkey, (kind, k, e) in zip(keys, _BRANCH_SPECS):
        if kind == "id":
            params.append(dict(kind="id"))
        elif kind == "std":
            k0, k1 = jax.random.split(bkey, 2)
            w = 0.1 * jax.random.normal(k0, (channels, channels), jnp.float32)
            s, b = _fold_bn(k1, channels)
            params.append(dict(kind="std", w=w, s=s, b=b))
        else:
            assert k % 2 == 1, "same-padding formula requires odd kernel"
            hidden = max(1, int(channels * e))
            kk = jax.random.split(bkey, 6)
            w1 = 0.1 * jax.random.normal(kk[0], (channels, hidden), jnp.float32)
            s1, b1 = _fold_bn(kk[1], hidden)
            wd = 0.1 * jax.random.normal(kk[2], (k, k, hidden), jnp.float32)
            s2, b2 = _fold_bn(kk[3], hidden)
            w2 = 0.1 * jax.random.normal(kk[4], (hidden, channels), jnp.float32)
            s3, b3 = _fold_bn(kk[5], channels)
            params.append(dict(kind=kind, k=k, w1=w1, s1=s1, b1=b1,
                               wd=wd, s2=s2, b2=b2, w2=w2, s3=s3, b3=b3))
    return params


def fold_block_params(params):
    """Fold eval-mode BN scale into conv weights and transpose into the
    (Cout, Cin) / (Chid, k*k) lane-friendly kernel layouts.  Called ONCE."""
    folded = []
    for p in params:
        if p["kind"] == "id":
            folded.append(dict(kind="id"))
        elif p["kind"] == "std":
            folded.append(dict(
                kind="std",
                w=(p["w"] * p["s"][None, :]).T,                      # (Cout, Cin)
                b=p["b"].reshape(-1, 1)))
        else:
            k = p["k"]
            chid = p["w1"].shape[1]
            folded.append(dict(
                kind=p["kind"], k=k,
                w1=(p["w1"] * p["s1"][None, :]).T,                   # (Chid, Cin)
                b1=p["b1"].reshape(-1, 1),
                wd=(p["wd"] * p["s2"]).reshape(k * k, chid).T,       # (Chid, k*k)
                b2=p["b2"].reshape(-1, 1),
                w2=(p["w2"] * p["s3"][None, :]).T,                   # (Cout, Chid)
                b3=p["b3"].reshape(-1, 1)))
    return folded


# ---------------------------------------------------------------------------
# Block forward (SelectOp fixed to a static branch index)
# ---------------------------------------------------------------------------

def block_forward(x_nchw, kparams, op_index):
    kp = kparams[op_index]
    if kp["kind"] == "id":
        return x_nchw
    N, C, H, W = x_nchw.shape
    x3 = x_nchw.reshape(N, C, H * W)        # free reshape: spatial -> lane dim
    if kp["kind"] == "std":
        y3 = std_branch(x3, kp)
    else:
        y3 = fused_ds_branch(x3, kp, H, W, has_res=(kp["kind"] == "mb"))
    return y3.reshape(N, C, H, W)


# ---------------------------------------------------------------------------
# Pure-JAX reference (uses the RAW, unfolded params)
# ---------------------------------------------------------------------------

def _ref_forward(x_nchw, params, op_index):
    p = params[op_index]
    if p["kind"] == "id":
        return x_nchw
    x = jnp.transpose(x_nchw, (0, 2, 3, 1))  # NHWC

    def pw(v, w, s, b, relu, res=None):
        y = jnp.einsum("nhwc,cd->nhwd", v, w) * s + b
        if relu:
            y = jnp.maximum(y, 0.0)
        if res is not None:
            y = y + res
        return y

    def dw(v, w, s, b, relu):
        k = w.shape[0]
        pad = (k - 1) // 2
        vp = jnp.pad(v, ((0, 0), (pad, pad), (pad, pad), (0, 0)))
        N, H, W, C = v.shape
        acc = jnp.zeros_like(v)
        for dy in range(k):
            for dx in range(k):
                acc = acc + vp[:, dy:dy + H, dx:dx + W, :] * w[dy, dx]
        y = acc * s + b
        if relu:
            y = jnp.maximum(y, 0.0)
        return y

    if p["kind"] == "std":
        y = pw(x, p["w"], p["s"], p["b"], True)
    else:
        y = pw(x, p["w1"], p["s1"], p["b1"], True)
        y = dw(y, p["wd"], p["s2"], p["b2"], True)
        y = pw(y, p["w2"], p["s3"], p["b3"], False,
               res=x if p["kind"] == "mb" else None)
    return jnp.transpose(y, (0, 3, 1, 2))


# ---------------------------------------------------------------------------
# Main
# ---------------------------------------------------------------------------

if __name__ == "__main__":
    key = jax.random.PRNGKey(0)
    kx, kprm = jax.random.split(key)

    N, C, H, W = 2, 4, 16, 16
    x = jax.random.normal(kx, (N, C, H, W), jnp.float32)

    raw_params = init_block_params(kprm, C)
    kparams = fold_block_params(raw_params)      # one-time BN fold / layout prep

    ok = True
    for op_index in range(len(_BRANCH_SPECS)):
        y = jax.block_until_ready(block_forward(x, kparams, op_index))
        y_ref = jax.block_until_ready(_ref_forward(x, raw_params, op_index))
        assert y.shape == x.shape and y.dtype == x.dtype
        if not np.allclose(np.asarray(y), np.asarray(y_ref), atol=1e-4, rtol=1e-4):
            ok = False
            print(f"mismatch on branch {op_index}")

    if ok:
        print("KERNEL_OK")
</pallas_src>

<mosaic_0001>
module attributes {stable_mosaic.version = 11 : i64} {
  func.func @_std_kernel(%arg0: i32, %arg1: i32, %arg2: memref<1x4x256xf32, #tpu.memory_space<vmem>>, %arg3: memref<4x4xf32, #tpu.memory_space<vmem>>, %arg4: memref<4x1xf32, #tpu.memory_space<vmem>>, %arg5: memref<1x4x256xf32, #tpu.memory_space<vmem>>) attributes {dimension_semantics = [#tpu.dimension_semantics<parallel>, #tpu.dimension_semantics<parallel>], iteration_bounds = array<i64: 2, 1>, scalar_prefetch = 0 : i64, scratch_operands = 0 : i64, tpu.core_type = #tpu.core_type<tc>, window_params = [{transform_indices = @transform_0, window_bounds = array<i64: 1, 4, 256>}, {pipeline_mode = #tpu.pipeline_mode<synchronous>, transform_indices = @transform_1, window_bounds = array<i64: 4, 4>}, {pipeline_mode = #tpu.pipeline_mode<synchronous>, transform_indices = @transform_2, window_bounds = array<i64: 4, 1>}, {transform_indices = @transform_3, window_bounds = array<i64: 1, 4, 256>}]} {
    %c0 = arith.constant 0 : index
    %c0_0 = arith.constant 0 : index
    %0 = vector.load %arg3[%c0, %c0_0] : memref<4x4xf32, #tpu.memory_space<vmem>>, vector<4x4xf32>
    %c0_1 = arith.constant 0 : index
    %c0_2 = arith.constant 0 : index
    %c0_3 = arith.constant 0 : index
    %1 = vector.load %arg2[%c0_1, %c0_2, %c0_3] : memref<1x4x256xf32, #tpu.memory_space<vmem>>, vector<1x4x256xf32>
    %2 = vector.shape_cast %1 : vector<1x4x256xf32> to vector<4x256xf32>
    %cst = arith.constant dense<0.000000e+00> : vector<4x256xf32>
    %3 = tpu.matmul %0, %2, %cst {dimension_numbers = #tpu.dot_dimension_numbers<[1], [0], [0], [1], [0, 0, 1, 1], [], []>} : vector<4x4xf32>, vector<4x256xf32>, vector<4x256xf32> -> vector<4x256xf32>
    %c0_4 = arith.constant 0 : index
    %c0_5 = arith.constant 0 : index
    %4 = vector.load %arg4[%c0_4, %c0_5] : memref<4x1xf32, #tpu.memory_space<vmem>>, vector<4x1xf32>
    %5 = vector.broadcast %4 : vector<4x1xf32> to vector<4x256xf32>
    %6 = arith.addf %3, %5 : vector<4x256xf32>
    %cst_6 = arith.constant 0.000000e+00 : f32
    %7 = vector.broadcast %cst_6 : f32 to vector<4x256xf32>
    %8 = arith.maximumf %6, %7 : vector<4x256xf32>
    %c0_7 = arith.constant 0 : index
    %c0_8 = arith.constant 0 : index
    %c0_9 = arith.constant 0 : index
    %9 = vector.load %arg5[%c0_7, %c0_8, %c0_9] : memref<1x4x256xf32, #tpu.memory_space<vmem>>, vector<1x4x256xf32>
    %10 = vector.shape_cast %9 : vector<1x4x256xf32> to vector<4x256xf32>
    %11 = vector.shape_cast %8 : vector<4x256xf32> to vector<1x4x256xf32>
    tpu.vector_store %arg5[%c0_7, %c0_8, %c0_9], %11 {strides = array<i32>} : memref<1x4x256xf32, #tpu.memory_space<vmem>>, vector<1x4x256xf32>,
    return
  }
  func.func @transform_0(%arg0: i32, %arg1: i32) -> (i32, i32, i32) {
    %c0_i32 = arith.constant 0 : i32
    %c0_i32_0 = arith.constant 0 : i32
    return %arg0, %c0_i32, %arg1 : i32, i32, i32
  }
  func.func @transform_1(%arg0: i32, %arg1: i32) -> (i32, i32) {
    %c0_i32 = arith.constant 0 : i32
    %c0_i32_0 = arith.constant 0 : i32
    %c0_i32_1 = arith.constant 0 : i32
    return %c0_i32, %c0_i32_0 : i32, i32
  }
  func.func @transform_2(%arg0: i32, %arg1: i32) -> (i32, i32) {
    %c0_i32 = arith.constant 0 : i32
    %c0_i32_0 = arith.constant 0 : i32
    %c0_i32_1 = arith.constant 0 : i32
    return %c0_i32, %c0_i32_0 : i32, i32
  }
  func.func @transform_3(%arg0: i32, %arg1: i32) -> (i32, i32, i32) {
    %c0_i32 = arith.constant 0 : i32
    %c0_i32_0 = arith.constant 0 : i32
    return %arg0, %c0_i32, %arg1 : i32, i32, i32
  }
}

</mosaic_0001>

<bundles_post_ra>
// kernel: tpu_custom_call.1
= control target key start
LH: loop header
LB: loop body
LE: loop exit
PB: predicated region body
PF: predicated region fallthrough
CT: control target
= control target key end

     0   :  { %8 = vsyncpa [#allocation3], 0  ;;  %s730_s0 = inlined_call_operand.hbm [shape: f32[2,4,256], index: 0, kind: input, shape index: {}]   ;;  %s731_s1 = inlined_call_operand.vmem [shape: f32[4,4], index: 1, kind: input, shape index: {}]   ;;  %s732_s2 = inlined_call_operand.vmem [shape: f32[4,1], index: 2, kind: input, shape index: {}]   ;;  %s733_s3 = inlined_call_operand.hbm [shape: f32[2,4,256], index: 3, kind: output, shape index: {}]  }
   0x1   :  { %10 = vsyncpa [#allocation3 + $0x1], 0 }
   0x2   :  { %11 = vsyncpa [#allocation4], 0 }
   0x3   :  { %13 = vsyncpa [#allocation4 + $0x1], 0  ;;  %s601_s12 = smov 0   ;;  %s603_s13 = smov 0  }
   0x4   :  { %s605_s14 = smov 0   ;;  %s607_s15 = smov 0  }
   0x5   :  { %s609_s16 = smov 0   ;;  %s611_s17 = smov 0  }
   0x6 LB: > { %s381_s18 = sadd.s32 4294967295, %s578_s17   ;;  %s382_s19 = sadd.s32 4294967294, %s578_s17   ;;  %s578_s17 = sphi %s611_s17, %s19_s17   ;;  %s574_s16 = sphi %s609_s16, %s742_s16   ;;  %s570_s15 = sphi %s607_s15, %s741_s15   ;;  %s566_s14 = sphi %s605_s14, %s740_s14   ;;  %s562_s13 = sphi %s603_s13, %s739_s13   ;;  %s558_s12 = sphi %s601_s12, %s738_s12  }
   0x7   : > { %s31_s20 = sadd.s32 1, %s574_s16  ;;  %s40_s21 = sadd.s32 1, %s566_s14 }
   0x8   : > { %p33_p0 = scmp.ge.s32.totalorder %s31_s20, 2  ;;  %p47_p1 = scmp.ne.s32.totalorder %s566_s14, %s562_s13 }
   0x9   : > { %p48_p2 = scmp.eq.s32.totalorder %s578_s17, 0  ;;  %p53_p3 = scmp.ne.s32.totalorder %s562_s13, %s558_s12 }
   0xa   : > { %s744_s20 = smov (%p33_p0, %s31_s20), 0  ;;  %p54_p5 = scmp.eq.s32.totalorder %s381_s18, 0 }
   0xb   : > { %p642_p4 = por %p48_p2, %p47_p1  ;;  %s35_s23 = ssub.s32 %s574_s16, %s744_s20 }
   0xc   : > { %p121_p6 = scmp.eq.s32.totalorder %s381_s18, 1  ;;  %p38_p7 = scmp.eq.s32.totalorder %s35_s23, 0 }
   0xd   : > { %p648_p8 = por %p54_p5, %p53_p3  ;;  %p127_p10 = scmp.eq.s32.totalorder %s382_s19, 1 }
   0xe   : > { %p652_p9 = por %p121_p6, %p47_p1  ;;  %p384_p12 = scmp.ge.s32.totalorder %s578_s17, 2 }
   0xf   : > { %s657_s26 = scalar_select %p38_p7, %s566_s14, %s40_s21  }
  0x10   : > { %p659_p11 = por %p127_p10, %p53_p3  ;;  %p414_p13 = scmp.lt.s32.totalorder %s578_s17, 2 }
  0x11   : > { %s153_s28 = sand.u32 1, %s566_s14   ;;  %s400_s30 = sshll.u32 %s574_s16, 3 }
  0x12   : > { %s385_s29 = sshll.u32 %s153_s28, 3  ;;  %s164_s6 = scalar_lea.hbm %s730_s0, %s400_s30 }
  0x13   : > { %s157_s7 = scalar_lea.vmem [#allocation2], %s385_s29  ;;  %s166_s9 = sshll.u32 %s164_s6, 4  ;;  %s167_s9 = int_to_ptr.hbm [resolvable:$true] %s166_s9 }
  0x14   : > { %s168_s8 = sshll.u32 %s157_s7, 4  ;;  %p407_p0 = pnand %p414_p13, %p642_p4  ;;  %s169_s8 = int_to_ptr.vmem [resolvable:$true] %s168_s8 }
  0x15   : > { %p388_p1 = scmp.ge.s32.totalorder %s578_s17, 1  ;;  %p173_p2 = scmp.lt.s32.totalorder %s578_s17, 3 }
  0x16   : > { %s154_s10 = scalar_lea.sflag [#allocation3], %s153_s28 }
  0x17   : > { %409 = dma.hbm_to_vmem [thread:$0]  (!%p407_p0), %s167_s9, 128, %s169_s8, %s154_s10  }
  0x18   : > { %p174_p3 = pnand %p388_p1, %p173_p2 }
  0x19   : > { %s675_s11 = sand.u32 (!%p174_p3), 1, %s562_s13  }
  0x1a   : > { %177 = sbr.rel (%p174_p3) target bundleno = 178 (0xb2), region = 32  ;;  %s389_s18 = sshll.u32 (!%p174_p3), %s675_s11, 3 }
  0x1b   : > { %s180_s19 = scalar_lea.sflag (!%p174_p3), [#allocation3], %s675_s11  ;;  %s183_s21 = scalar_lea.vmem (!%p174_p3), [#allocation2], %s389_s18 }
  0x1f   : > { %549 = dma.done.wait (%p648_p8), %s180_s19, 128  }
  0x20   : > { %551 = vsyncadd (%p648_p8), %s180_s19, 4294967168  ;;  %v580_v0 = vmov 0   ;;  %v210_v1 = vld [vmem:[%s183_s21] sm:$0xff]  ;;  %v211_v2 = vld [vmem:[%s732_s2] sm:$0xf]  ;;  %vm225_vm0 = vcmask 1043456  }
  0x21   : > { %465 = vset.pattern.permute.xlu0 %v580_v0  ;;  %218 = vst [vmem:[#allocation1] ss:$2 sm:$0xff] %v210_v1  ;;  %v209_v3 = vld [vmem:[%s731_s1] sm:$0xf]  ;;  %vm221_vm1 = vcmask 31744   ;;  %s401_s24 = sshll.u32 %s570_s15, 3 }
  0x22   : > { %214 = vperm.xlu0 %465, %v211_v2   ;;  %s292_s5 = scalar_lea.hbm %s733_s3, %s401_s24  ;;  %s206_s6 = scalar_lea.vmem [#allocation5], %s389_s18 }
  0x23   : > { %s294_s7 = sshll.u32 %s206_s6, 4  ;;  %s296_s8 = sshll.u32 %s292_s5, 4  ;;  %s295_s7 = int_to_ptr.vmem [resolvable:$true] %s294_s7  ;;  %s297_s8 = int_to_ptr.hbm [resolvable:$true] %s296_s8 }
  0x24   : > { %s279_s15 = scalar_lea.sflag [#allocation4], %s675_s11  ;;  %s510_s9 = sshra.s32 %s297_s8, 4  ;;  %s511_s9 = int_to_ptr.hbm [resolvable:$true] %s510_s9 }
  0x25   : > { %s512_s10 = scalar_lea.hbm %s511_s9, 8  ;;  %s516_s18 = scalar_lea.hbm %s733_s3, 16 }
  0x26   : > { %p513_p4 = scmp.ne.s32.totalorder %s511_s9, %s512_s10  ;;  %p517_p7 = scmp.lt.s32.totalorder %s511_s9, %s733_s3 }
  0x27   : > { %p518_p8 = scmp.lt.s32.totalorder %s516_s18, %s512_s10 }
  0x28   : > { %v219_v4 = vld.sshfl [vmem:[#allocation1] sm:$0xff pattern:$0x75316420]  ;;  %v220_v5 = vld.sshfl [vmem:[#allocation1 + $0x8] sm:$0xff pattern:$0x75316420]  ;;  %p514_p5 = pnand %p513_p4, %p652_p9 }
  0x29   : > { %391 = vmatpush.msk.msra.mxu0 %vm225_vm0, %v219_v4  ;;  %393 = vmatpush.msk.msra.mxu1 %vm225_vm0, %v220_v5  ;;  %p519_p10 = por %p518_p8, %p517_p7 }
  0x2a   : > { %392 = vmatmul.msk.f32.vlgmr.msra.gmra.mxu0 %vm221_vm1, %v209_v3  ;;  %394 = vmatmul.msk.f32.vlgmr.msra.gmra.mxu1 %vm221_vm1, %v209_v3  ;;  %p515_p6 = pneg %p514_p5 }
  0x2c   : > { %p520_p13 = pnand %p519_p10, %p515_p6 }
  0x94   : > { %v215_v6 = vpop.permute.xlu0 %214 }
  0xa7   : > { %v247_v7 = vpop.f32.mrf.mxu0  ;;  %v267_v8 = vpop.f32.mrf.mxu1 }
  0xa8   : > { %v248_v9 = vadd.f32 %v247_v7, %v215_v6  ;;  %v268_v10 = vadd.f32 %v267_v8, %v215_v6 }
  0xaa   : > { %v271_v11 = vmax.f32 %v268_v10, 0.0  ;;  %v270_v12 = vmax.f32 %v248_v9, 0.0 }
  0xac   : > { %v274_v13 = vrot.slane %v271_v11, 4 }
  0xae   : > { %v275_v14 = vsel %vm225_vm0, %v270_v12, %v274_v13 }
  0xaf   : > { %277 = vst [vmem:[%s206_s6] sm:$0xff] %v275_v14 }
  0xb0   : > { %523 = shalt.err (!%p520_p13)
}
  0xb1   : > { %404 = dma.vmem_to_hbm [thread:$0]  (%p652_p9), %s295_s7, 128, %s297_s8, %s279_s15  }
  0xb2 PF: > { %s308_s11 = sand.u32 1, %s558_s12   ;;  %p411_p0 = pnand %p384_p12, %p659_p11 }
  0xb3   : > { %s309_s28 = scalar_lea.sflag [#allocation4], %s308_s11 }
  0xb4   : > { %p412_p1 = pneg %p411_p0 }
  0xb6   : > { %553 = dma.done.wait (%p412_p1), %s309_s28, 128  }
  0xb7   : > { %555 = vsyncadd (%p412_p1), %s309_s28, 4294967168  ;;  %s19_s17 = sadd.s32 1, %s578_s17   ;;  %s738_s12 = smov %s562_s13 }
  0xb8   : > { %p16_p2 = scmp.ge.s32.totalorder %s19_s17, 4   ;;  %s739_s13 = smov %s566_s14 }
  0xb9   : > { %s740_s14 = smov %s657_s26  ;;  %s741_s15 = smov %s574_s16 }
  0xba   : > { %s742_s16 = smov %s744_s20  ;;  %18 = sbr.rel (!%p16_p2) target bundleno = 6 (0x6), region = 77 }
  0xbf   :  { %315 = vsyncpa [#allocation3], 1 }
  0xc0   :  { %317 = vsyncpa [#allocation3 + $0x1], 1 }
  0xc1   :  { %318 = vsyncpa [#allocation4], 1 }
  0xc2   :  { %320 = vsyncpa [#allocation4 + $0x1], 1 }

</bundles_post_ra>
